<compile_context>
chip_gen: v7x
topology: tpu7x:2x2x1
jax: 0.10.0
libtpu: 0.0.40
codegen_flags: <defaults>
</compile_context>

<pallas_src>
import jax
import jax.numpy as jnp
from jax.experimental import pallas as pl
from jax.experimental.pallas import tpu as pltpu


# NOTE: the PyTorch module hard-codes this normalization; it does NOT track the
# feature width D, so it is kept as a literal constant here as well.
_SCALE = 1.0 / (10 * 10 * 128)


def crossnet_kernel(x_ref, w_ref, consts_ref, o_ref):
    """One batch tile of the restructured CrossNet forward.

    x_ref:      (tb, D)  input tile (f32 or bf16; compute in f32)
    w_ref:      (L, D)   all cross-layer weights, VMEM-resident across grid steps
    consts_ref: (L + 1,) SMEM scalars: [h_0, ..., h_{L-1}, c_final]
                  h_l     = sum_{j<l} <b_j, w_l>
                  c_final = _SCALE * sum_j sum_d b_j[d]
    o_ref:      (tb, 1)  per-sample output column (f32)
    """
    num_layers = w_ref.shape[0]
    x0 = x_ref[...].astype(jnp.float32)                              # (tb, D)

    # Per-sample projections <x_0, w_l>: one VPU multiply + one XLU lane-reduce
    # per layer per vreg-row (no keep-alive of any per-layer (tb, D) update).
    # These could also be fused into a single MXU matmul x0 @ [w_0..w_{L-1}, 1],
    # but the VPU/XLU path keeps exact f32 precision and already fits under the
    # HBM roofline after the restructure.
    projs = []
    for l in range(num_layers):
        w_row = w_ref[l:l + 1, :].astype(jnp.float32)                # (1, D)
        projs.append(jnp.sum(x0 * w_row, axis=1, keepdims=True))     # (tb, 1)

    # Scaled per-sample feature sum of x_0 (1/12800 folded in -> no epilogue mul).
    r0s = jnp.sum(x0, axis=1, keepdims=True) * _SCALE                # (tb, 1)

    # Per-sample scalar recursion: alpha_{l+1} = alpha_l * (1 + <x_0, w_l>) + h_l
    alpha = jnp.ones_like(r0s)
    for l in range(num_layers):
        alpha = alpha * (1.0 + projs[l]) + consts_ref[l]

    # out = alpha_L * (scale * sum_D x_0) + scale * sum_j sum_D b_j
    o_ref[...] = (alpha * r0s + consts_ref[num_layers]).astype(o_ref.dtype)


def _choose_batch_tile(batch, tb_target):
    """Pick a batch tile: a multiple of 128 (sublane/lane friendly), capped so
    the grid keeps >= 2 steps (v7x 2-TC split + DMA/compute overlap), and
    preferring an exact divisor of `batch` (no masked remainder block)."""
    if batch <= 128:
        return batch                                  # single full-array block
    tb = max(128, (min(tb_target, batch) // 128) * 128)
    # Keep at least two grid steps so the "parallel" axis can shard over 2 TCs.
    while tb > 128 and pl.cdiv(batch, tb) < 2:
        tb -= 128
    # Prefer a divisor of `batch` if a reasonably large one exists; otherwise
    # the last (partial) block is handled by Pallas' boundary masking.
    for cand in range(tb, 127, -128):
        if batch % cand == 0:
            if cand * 2 >= tb:
                tb = cand
            break
    return tb


def crossnet_forward(x, kernels, bias, *, tb=2048):
    """CrossNet forward. x: (B, D) f32/bf16, kernels/bias: (L, D). Returns (B,) f32.

    tb: target batch tile (multiple of 128). Default 2048 (~1 MiB f32 x tile);
    sweep 2048..4096 for large batches. bf16 x halves HBM traffic; compute
    stays f32 and the output is always f32.
    """
    batch, feat = x.shape
    num_layers = kernels.shape[0]

    tile = _choose_batch_tile(batch, tb)
    num_tiles = pl.cdiv(batch, tile)

    # Batch-independent constants of the restructured recursion, computed once
    # outside the kernel (tiny (L, D) reads; negligible HBM traffic).
    w32 = kernels.astype(jnp.float32)
    b32 = bias.astype(jnp.float32)
    g = jnp.dot(b32, w32.T)                                          # g[j, l] = <b_j, w_l>
    strict = jnp.triu(jnp.ones((num_layers, num_layers), jnp.float32), k=1)
    h = jnp.sum(g * strict, axis=0)                                  # (L,)  h_l = sum_{j<l} g[j, l]
    c_final = (_SCALE * jnp.sum(b32)).reshape(1)                     # (1,)
    consts = jnp.concatenate([h, c_final]).astype(jnp.float32)       # (L + 1,)

    # Explicit scoped-VMEM limit: raises v5e's 16 MiB default for big tiles,
    # capped at 64 MiB so it is always legal on v7x.
    x_block_bytes = tile * feat * x.dtype.itemsize
    vmem_needed = 2 * x_block_bytes + 2 * tile * 4 + 2 * num_layers * feat * 4 + (1 << 20)
    vmem_limit = int(min(64 << 20, max(32 << 20, 2 * vmem_needed)))

    out = pl.pallas_call(
        crossnet_kernel,
        out_shape=jax.ShapeDtypeStruct((batch, 1), jnp.float32),
        grid_spec=pltpu.PrefetchScalarGridSpec(
            num_scalar_prefetch=0,
            grid=(num_tiles,),
            in_specs=[
                pl.BlockSpec((tile, feat), lambda i: (i, 0)),            # batch tile of x
                pl.BlockSpec((num_layers, feat), lambda i: (0, 0)),      # resident weights
                pl.BlockSpec(memory_space=pltpu.MemorySpace.SMEM),       # tiny scalar consts
            ],
            out_specs=pl.BlockSpec((tile, 1), lambda i: (i, 0)),
        ),
        compiler_params=pltpu.CompilerParams(
            dimension_semantics=("parallel",),
            vmem_limit_bytes=vmem_limit),
    )(x, kernels, consts)

    # torch.squeeze(): identical to (B,) for B > 1 (B == 1 would give a scalar).
    return out.reshape(batch)


if __name__ == "__main__":
    B, D, L = 256, 128, 2  # batch, in_features, layer_num

    key = jax.random.PRNGKey(0)
    kx, kw, kb = jax.random.split(key, 3)

    x = jax.random.normal(kx, (B, D), dtype=jnp.float32)
    # kernels[i]: xavier_normal for a (D, 1) matrix -> std = sqrt(2 / (D + 1)).
    xavier_std = (2.0 / (D + 1)) ** 0.5
    kernels = xavier_std * jax.random.normal(kw, (L, D), dtype=jnp.float32)
    # The module initializes bias to zeros; use a small non-zero bias here so
    # the bias terms (h_l, c_final) of the restructured recursion are exercised.
    bias = 0.1 * jax.random.normal(kb, (L, D), dtype=jnp.float32)

    # Tile chooser picks tb=128 here -> grid of 2 steps, exercising the
    # multi-tile "parallel" path; production batches use the larger default.
    out = crossnet_forward(x, kernels, bias)
    out = jax.block_until_ready(out)

    # Pure-JAX reference of the original layer-by-layer forward.
    x0 = x
    xl = x
    for i in range(L):
        s = jnp.sum(xl * kernels[i][None, :], axis=1, keepdims=True)
        xl = x0 * s + bias[i][None, :] + xl
    ref = jnp.sum(xl, axis=1) / (10 * 10 * 128)

    assert out.shape == (B,)
    assert jnp.allclose(out, ref, rtol=1e-5, atol=1e-6), (out, ref)
    print("KERNEL_OK")
</pallas_src>

<mosaic_0001>
module attributes {stable_mosaic.version = 11 : i64} {
  func.func @crossnet_kernel(%arg0: i32, %arg1: memref<128x128xf32, #tpu.memory_space<vmem>>, %arg2: memref<2x128xf32, #tpu.memory_space<vmem>>, %arg3: memref<3xf32, #tpu.memory_space<smem>>, %arg4: memref<128x1xf32, #tpu.memory_space<vmem>>) attributes {dimension_semantics = [#tpu.dimension_semantics<parallel>], iteration_bounds = array<i64: 2>, scalar_prefetch = 0 : i64, scratch_operands = 0 : i64, tpu.core_type = #tpu.core_type<tc>, window_params = [{transform_indices = @transform_0, window_bounds = array<i64: 128, 128>}, {pipeline_mode = #tpu.pipeline_mode<synchronous>, transform_indices = @transform_1, window_bounds = array<i64: 2, 128>}, {transform_indices = @transform_2, window_bounds = array<i64: 3>}, {transform_indices = @transform_3, window_bounds = array<i64: 128, 1>}]} {
    %c0 = arith.constant 0 : index
    %c0_0 = arith.constant 0 : index
    %0 = vector.load %arg1[%c0, %c0_0] : memref<128x128xf32, #tpu.memory_space<vmem>>, vector<128x128xf32>
    %c0_1 = arith.constant 0 : index
    %c0_2 = arith.constant 0 : index
    %1 = vector.load %arg2[%c0_1, %c0_2] : memref<2x128xf32, #tpu.memory_space<vmem>>, vector<1x128xf32>
    %2 = vector.broadcast %1 : vector<1x128xf32> to vector<128x128xf32>
    %3 = arith.mulf %0, %2 : vector<128x128xf32>
    %cst = arith.constant dense<0.000000e+00> : vector<128xf32>
    %4 = vector.multi_reduction <add>, %3, %cst [1] : vector<128x128xf32> to vector<128xf32>
    %5 = vector.shape_cast %4 : vector<128xf32> to vector<128x1xf32>
    %c1 = arith.constant 1 : index
    %c0_3 = arith.constant 0 : index
    %6 = vector.load %arg2[%c1, %c0_3] : memref<2x128xf32, #tpu.memory_space<vmem>>, vector<1x128xf32>
    %7 = vector.broadcast %6 : vector<1x128xf32> to vector<128x128xf32>
    %8 = arith.mulf %0, %7 : vector<128x128xf32>
    %cst_4 = arith.constant dense<0.000000e+00> : vector<128xf32>
    %9 = vector.multi_reduction <add>, %8, %cst_4 [1] : vector<128x128xf32> to vector<128xf32>
    %10 = vector.shape_cast %9 : vector<128xf32> to vector<128x1xf32>
    %cst_5 = arith.constant dense<0.000000e+00> : vector<128xf32>
    %11 = vector.multi_reduction <add>, %0, %cst_5 [1] : vector<128x128xf32> to vector<128xf32>
    %12 = vector.shape_cast %11 : vector<128xf32> to vector<128x1xf32>
    %cst_6 = arith.constant 7.812500e-05 : f32
    %13 = vector.broadcast %cst_6 : f32 to vector<128x1xf32>
    %14 = arith.mulf %12, %13 : vector<128x1xf32>
    %cst_7 = arith.constant 1.000000e+00 : f32
    %15 = vector.broadcast %cst_7 : f32 to vector<128x1xf32>
    %cst_8 = arith.constant 1.000000e+00 : f32
    %16 = vector.broadcast %cst_8 : f32 to vector<128x1xf32>
    %17 = arith.addf %16, %5 : vector<128x1xf32>
    %18 = arith.mulf %15, %17 : vector<128x1xf32>
    %c0_9 = arith.constant 0 : index
    %19 = memref.load %arg3[%c0_9] : memref<3xf32, #tpu.memory_space<smem>>
    %20 = vector.broadcast %19 : f32 to vector<128x1xf32>
    %21 = arith.addf %18, %20 : vector<128x1xf32>
    %cst_10 = arith.constant 1.000000e+00 : f32
    %22 = vector.broadcast %cst_10 : f32 to vector<128x1xf32>
    %23 = arith.addf %22, %10 : vector<128x1xf32>
    %24 = arith.mulf %21, %23 : vector<128x1xf32>
    %c1_11 = arith.constant 1 : index
    %25 = memref.load %arg3[%c1_11] : memref<3xf32, #tpu.memory_space<smem>>
    %26 = vector.broadcast %25 : f32 to vector<128x1xf32>
    %27 = arith.addf %24, %26 : vector<128x1xf32>
    %28 = arith.mulf %27, %14 : vector<128x1xf32>
    %c2 = arith.constant 2 : index
    %29 = memref.load %arg3[%c2] : memref<3xf32, #tpu.memory_space<smem>>
    %30 = vector.broadcast %29 : f32 to vector<128x1xf32>
    %31 = arith.addf %28, %30 : vector<128x1xf32>
    %c0_12 = arith.constant 0 : index
    %c0_13 = arith.constant 0 : index
    %32 = vector.load %arg4[%c0_12, %c0_13] : memref<128x1xf32, #tpu.memory_space<vmem>>, vector<128x1xf32>
    tpu.vector_store %arg4[%c0_12, %c0_13], %31 {strides = array<i32>} : memref<128x1xf32, #tpu.memory_space<vmem>>, vector<128x1xf32>,
    return
  }
  func.func @transform_0(%arg0: i32) -> (i32, i32) {
    %c0_i32 = arith.constant 0 : i32
    %c0_i32_0 = arith.constant 0 : i32
    return %arg0, %c0_i32 : i32, i32
  }
  func.func @transform_1(%arg0: i32) -> (i32, i32) {
    %c0_i32 = arith.constant 0 : i32
    %c0_i32_0 = arith.constant 0 : i32
    %c0_i32_1 = arith.constant 0 : i32
    return %c0_i32, %c0_i32_0 : i32, i32
  }
  func.func @transform_2(%arg0: i32) -> i32 {
    %c0_i32 = arith.constant 0 : i32
    %c0_i32_0 = arith.constant 0 : i32
    return %c0_i32 : i32
  }
  func.func @transform_3(%arg0: i32) -> (i32, i32) {
    %c0_i32 = arith.constant 0 : i32
    %c0_i32_0 = arith.constant 0 : i32
    return %arg0, %c0_i32 : i32, i32
  }
}

</mosaic_0001>

<bundles_post_ra>
// kernel: tpu_custom_call.1
= control target key start
LH: loop header
LB: loop body
LE: loop exit
PB: predicated region body
PF: predicated region fallthrough
CT: control target
= control target key end

     0   :  { %8 = vsyncpa [#allocation3], 0  ;;  %s1125_s0 = inlined_call_operand.hbm [shape: f32[256,128], index: 0, kind: input, shape index: {}]   ;;  %s1126_s1 = inlined_call_operand.vmem [shape: f32[2,128], index: 1, kind: input, shape index: {}]   ;;  %s1127_s2 = inlined_call_operand.vmem [shape: f32[3], index: 2, kind: input, shape index: {}]   ;;  %s1128_s3 = inlined_call_operand.vmem [shape: f32[256,1], index: 3, kind: output, shape index: {}]  }
   0x1   :  { %10 = vsyncpa [#allocation3 + $0x1], 0 }
   0x2   :  { %11 = vsyncpa [#allocation4], 0  ;;  %s772_s12 = smov 0   ;;  %s774_s13 = smov 0  }
   0x3   :  { %s776_s14 = smov 0   ;;  %s778_s15 = smov 0  }
   0x4 LB: > { %s591_s16 = sadd.s32 4294967295, %s746_s15   ;;  %s792_s17 = sadd.s32 1, %s746_s15   ;;  %s746_s15 = sphi %s778_s15, %s1141_s15   ;;  %s742_s14 = sphi %s776_s14, %s1140_s14   ;;  %s738_s13 = sphi %s774_s13, %s1139_s13   ;;  %s734_s12 = sphi %s772_s12, %s1138_s12  }
   0x5   : > { %s21_s18 = ssub.s32 %s746_s15, %s792_s17  ;;  %s24_s19 = sadd.s32 1, %s742_s14 }
   0x6   : > { %p22_p0 = scmp.eq.s32.totalorder %s21_s18, 0  ;;  %p31_p1 = scmp.ne.s32.totalorder %s742_s14, %s738_s13 }
   0x7   : > { %p32_p2 = scmp.eq.s32.totalorder %s746_s15, 0  ;;  %p37_p3 = scmp.ne.s32.totalorder %s738_s13, %s734_s12 }
   0x8   : > { %s802_s20 = scalar_select %p22_p0, %s742_s14, %s24_s19  }
   0x9   : > { %p33_p4 = por %p32_p2, %p31_p1  ;;  %p806_p5 = scmp.eq.s32.totalorder %s591_s16, 0 }
   0xa   : > { %p593_p6 = scmp.ge.s32.totalorder %s746_s15, 1  ;;  %p116_p7 = scmp.lt.s32.totalorder %s746_s15, 3 }
   0xb   : > { %p814_p8 = por %p806_p5, %p37_p3  ;;  %s132_s26 = sshll.u32 %s1127_s2, 4  ;;  %s133_s26 = int_to_ptr.vmem [resolvable:$true] %s132_s26 }
   0xc   : > { %p818_p9 = pnand %p593_p6, %p116_p7  ;;  %p626_p11 = scmp.lt.s32.totalorder %s746_s15, 2 }
   0xd   : > { %s1132_s22 = scalar_select %p814_p8, 1, 0 }
   0xe   : > { %s1133_s23 = scalar_select %p818_p9, 1, 0 }
   0xf   : > { %p617_p10 = pneg %p818_p9  ;;  %s143_s27 = sand.u32 1, %s742_s14  }
  0x10   : > { %p835_p13 = pnand %p626_p11, %p33_p4  ;;  %s596_s30 = sshll.u32 %s143_s27, 7 }
  0x11   : > { %p831_p12 = pnand %p617_p10, %p806_p5  ;;  %s663_s4 = scalar_lea.vmem %s133_s26, 16 }
  0x12   : > { %p664_p0 = scmp.ne.s32.totalorder %s133_s26, %s663_s4  ;;  %p671_p6 = scmp.lt.s32.totalorder %s133_s26, %s133_s26 }
  0x13   : > { %p665_p1 = pneg %p831_p12  ;;  %p672_p7 = scmp.lt.s32.totalorder %s663_s4, %s663_s4 }
  0x15   : > { %p666_p2 = pnand %p665_p1, %p664_p0  ;;  %p673_p8 = por %p672_p7, %p671_p6 }
  0x17   : > { %p667_p3 = pneg %p666_p2 }
  0x19   : > { %p674_p9 = pnand %p673_p8, %p667_p3 }
  0x1b   : > { %677 = shalt.err (!%p674_p9)
}
  0x1c   : > { %s748_s5 = smov [#allocation5]   ;;  %s610_s6 = sshll.u32 %s746_s15, 11 }
  0x1d   : > { %620 = dma.vmem_to_smem (!%p831_p12), %s133_s26, 16, %s748_s5, [#allocation4]  }
  0x1e   : > { %s847_s9 = scalar_lea.hbm %s1125_s0, %s610_s6  ;;  %s147_s10 = scalar_lea.vmem [#allocation2], %s596_s30 }
  0x1f   : > { %s154_s11 = sshll.u32 %s147_s10, 4  ;;  %s851_s12 = scalar_lea.sflag [#allocation3], %s143_s27  ;;  %s849_s11 = int_to_ptr.vmem [resolvable:$true] %s154_s11 }
  0x20   : > { %s678_s18 = scalar_lea.hbm %s847_s9, 2048  ;;  %p680_p8 = pneg %p835_p13 }
  0x21   : > { %p679_p4 = scmp.ne.s32.totalorder %s847_s9, %s678_s18  ;;  %s683_s25 = scalar_lea.hbm %s1125_s0, 4096 }
  0x22   : > { %p684_p11 = scmp.lt.u32.totalorder %s847_s9, %s1125_s0  ;;  %p685_p12 = scmp.lt.u32.totalorder %s683_s25, %s678_s18 }
  0x23   : > { %p681_p9 = pnand %p680_p8, %p679_p4  ;;  %p687_p1 = scmp.lt.u32.totalorder %s678_s18, %s847_s9 }
  0x24   : > { %p686_p0 = por %p685_p12, %p684_p11 }
  0x25   : > { %p682_p10 = pneg %p681_p9 }
  0x26   : > { %p688_p2 = por %p687_p1, %p686_p0 }
  0x28   : > { %p689_p3 = pnand %p688_p2, %p682_p10 }
  0x2a   : > { %692 = shalt.err (!%p689_p3)
}
  0x2b   : > { %s693_s27 = scalar_lea.vmem %s849_s11, 2048  ;;  %s749_s30 = smov [#allocation2]  }
  0x2c   : > { %p694_p6 = scmp.ne.s32.totalorder %s849_s11, %s693_s27  ;;  %s698_s4 = sshll.u32 %s749_s30, 4  ;;  %s699_s4 = int_to_ptr.vmem [resolvable:$false] %s698_s4 }
  0x2d   : > { %s700_s5 = scalar_lea.vmem %s699_s4, 4096  ;;  %p701_p9 = scmp.lt.s32.totalorder %s849_s11, %s699_s4 }
  0x2e   : > { %p696_p7 = pnand %p694_p6, %p680_p8  ;;  %p702_p11 = scmp.lt.s32.totalorder %s700_s5, %s693_s27 }
  0x30   : > { %p697_p4 = pneg %p696_p7  ;;  %p703_p12 = por %p702_p11, %p701_p9 }
  0x32   : > { %p704_p0 = pnand %p703_p12, %p697_p4 }
  0x34   : > { %707 = shalt.err (!%p704_p0)
}
  0x35   : > { %s750_s6 = smov 128   ;;  %s751_s7 = smov 8  }
  0x36   : > { %624 = dma.hbm_to_vmem [thread:$0]  (!%p835_p13), %s847_s9, 2048, %s849_s11, %s851_s12, %s750_s6, %s750_s6, %s751_s7  }
  0x37   : > { %p1136_p8 = scmp.ne.s32.totalorder %s1133_s23, 0 }
  0x38   : > { %s168_s8 = sand.u32 (!%p1136_p8), 1, %s738_s13   ;;  %p1137_p10 = scmp.ne.s32.totalorder (!%p1136_p8), %s1132_s22, 0 }
  0x39   : > { %166 = sbr.rel (%p1136_p8) target bundleno = 314 (0x13a), region = 32  ;;  %s600_s10 = sshll.u32 (!%p1136_p8), %s168_s8, 7 }
  0x3a   : > { %s169_s18 = scalar_lea.sflag (!%p1136_p8), [#allocation3], %s168_s8  ;;  %s882_s19 = scalar_lea.vmem (!%p1136_p8), [#allocation2], %s600_s10 }
  0x40   : > { %725 = dma.done.wait (%p1137_p10), %s169_s18, 2048  }
  0x41   : > { %727 = vsyncadd (%p1137_p10), %s169_s18, 4294965248 }
  0x42   : > { %729 = dma.done.wait (%p806_p5), [#allocation4], 16  }
  0x43   : > { %731 = vsyncadd (%p806_p5), [#allocation4], 4294967280 }
  0x44   : > { %181 = sfence }
  0x45   : > { %v893_v0 = vld [vmem:[%s882_s19 + $0x10] sm:$0xff]  ;;  %v604_v1 = vld [vmem:[%s1126_s1] ss:$0 sm:$0xff]  ;;  %v904_v5 = vld [vmem:[%s882_s19 + $0x18] sm:$0xff]  ;;  %s393_s9 = sld [smem:[#allocation5]]  ;;  %s606_s11 = sld [smem:[#allocation5 + $0x1]] }
  0x46   : > { %v899_v2 = vld [vmem:[%s882_s19] sm:$0xff]  ;;  %v230_v3 = vmul.f32 %v604_v1, %v893_v0  ;;  %v907_v6 = vld [vmem:[%s882_s19 + $0x8] sm:$0xff]  ;;  %v231_v7 = vmul.f32 %v604_v1, %v904_v5  ;;  %v920_v13 = vld [vmem:[%s882_s19 + $0x38] sm:$0xff]  ;;  %s602_s12 = sshll.u32 %s591_s16, 4  ;;  %s996_s24 = sld [smem:[#allocation5 + $0x2]]  ;;  %vm495_vm0 = vcmask 7168  }
  0x47   : > { %v228_v4 = vmul.f32 %v604_v1, %v899_v2  ;;  %v229_v8 = vmul.f32 %v604_v1, %v907_v6  ;;  %v912_v9 = vld [vmem:[%s882_s19 + $0x28] sm:$0xff]  ;;  %v915_v10 = vld [vmem:[%s882_s19 + $0x20] sm:$0xff]  ;;  %v923_v14 = vld [vmem:[%s882_s19 + $0x30] sm:$0xff]  ;;  %v235_v15 = vmul.f32 %v604_v1, %v920_v13  ;;  %p202_p5 = scmp.lt.s32.totalorder %s602_s12, 31 }
  0x48   : > { %248 = vadd.xlane.f32.xlu1 %v230_v3  ;;  %v233_v11 = vmul.f32 %v604_v1, %v912_v9  ;;  %v232_v12 = vmul.f32 %v604_v1, %v915_v10  ;;  %v234_v16 = vmul.f32 %v604_v1, %v923_v14  ;;  %v928_v17 = vld [vmem:[%s882_s19 + $0x48] sm:$0xff]  ;;  %v931_v18 = vld [vmem:[%s882_s19 + $0x40] sm:$0xff]  ;;  %v218_v21 = vld [vmem:[%s882_s19 + $0x58] sm:$0xff] }
  0x49   : > { %244 = vadd.xlane.f32.xlu0 %v228_v4  ;;  %v237_v19 = vmul.f32 %v604_v1, %v928_v17  ;;  %v236_v20 = vmul.f32 %v604_v1, %v931_v18  ;;  %v217_v22 = vld [vmem:[%s882_s19 + $0x50] sm:$0xff]  ;;  %v239_v23 = vmul.f32 %v604_v1, %v218_v21  ;;  %v220_v25 = vld [vmem:[%s882_s19 + $0x68] sm:$0xff]  ;;  %v219_v26 = vld [vmem:[%s882_s19 + $0x60] sm:$0xff]  ;;  %s1143_s12 = smov (!%p202_p5, %s602_s12), 31 }
  0x4a   : > { %v238_v24 = vmul.f32 %v604_v1, %v217_v22  ;;  %v241_v27 = vmul.f32 %v604_v1, %v220_v25  ;;  %v240_v28 = vmul.f32 %v604_v1, %v219_v26  ;;  %v222_v29 = vld [vmem:[%s882_s19 + $0x78] sm:$0xff]  ;;  %v221_v30 = vld [vmem:[%s882_s19 + $0x70] sm:$0xff]  ;;  %v605_v33 = vld [vmem:[%s1126_s1 + $0x1] ss:$0 sm:$0xff]  ;;  %s603_s15 = sshll.u32 %s1143_s12, 3 }
  0x4b   : > { %v243_v31 = vmul.f32 %v604_v1, %v222_v29  ;;  %v242_v32 = vmul.f32 %v604_v1, %v221_v30  ;;  %v282_v34 = vmul.f32 %v605_v33, %v907_v6  ;;  %v281_v35 = vmul.f32 %v605_v33, %v899_v2  ;;  %s1024_s26 = scalar_lea.vmem %s1128_s3, %s603_s15 }
  0x4c   : > { %250 = vadd.xlane.f32.xlu1 %v231_v7  ;;  %v284_v36 = vmul.f32 %v605_v33, %v904_v5  ;;  %v283_v37 = vmul.f32 %v605_v33, %v893_v0  ;;  %v286_v38 = vmul.f32 %v605_v33, %v912_v9  ;;  %v285_v39 = vmul.f32 %v605_v33, %v915_v10 }
  0x4d   : > { %246 = vadd.xlane.f32.xlu0 %v229_v8  ;;  %v288_v40 = vmul.f32 %v605_v33, %v920_v13  ;;  %v287_v41 = vmul.f32 %v605_v33, %v923_v14  ;;  %v290_v42 = vmul.f32 %v605_v33, %v928_v17  ;;  %v289_v43 = vmul.f32 %v605_v33, %v931_v18 }
  0x4e   : > { %v292_v44 = vmul.f32 %v605_v33, %v218_v21  ;;  %v291_v45 = vmul.f32 %v605_v33, %v217_v22  ;;  %v294_v46 = vmul.f32 %v605_v33, %v220_v25  ;;  %v293_v47 = vmul.f32 %v605_v33, %v219_v26 }
  0x4f   : > { %v296_v48 = vmul.f32 %v605_v33, %v222_v29  ;;  %v295_v49 = vmul.f32 %v605_v33, %v221_v30  ;;  %v1004_v33 = vstv %s606_s11 }
  0x50   : > { %254 = vadd.xlane.f32.xlu1 %v233_v11 }
  0x51   : > { %252 = vadd.xlane.f32.xlu0 %v232_v12 }
  0x54   : > { %258 = vadd.xlane.f32.xlu1 %v235_v15 }
  0x55   : > { %256 = vadd.xlane.f32.xlu0 %v234_v16  ;;  %v990_v16 = vstv %s393_s9 }
  0x58   : > { %262 = vadd.xlane.f32.xlu1 %v237_v19 }
  0x59   : > { %260 = vadd.xlane.f32.xlu0 %v236_v20 }
  0x5c   : > { %266 = vadd.xlane.f32.xlu1 %v239_v23 }
  0x5d   : > { %264 = vadd.xlane.f32.xlu0 %v238_v24 }
  0x60   : > { %270 = vadd.xlane.f32.xlu1 %v241_v27 }
  0x61   : > { %268 = vadd.xlane.f32.xlu0 %v240_v28 }
  0x64   : > { %274 = vadd.xlane.f32.xlu1 %v243_v31 }
  0x65   : > { %272 = vadd.xlane.f32.xlu0 %v242_v32 }
  0x68   : > { %299 = vadd.xlane.f32.xlu1 %v282_v34 }
  0x69   : > { %297 = vadd.xlane.f32.xlu0 %v281_v35 }
  0x6c   : > { %303 = vadd.xlane.f32.xlu1 %v284_v36 }
  0x6d   : > { %301 = vadd.xlane.f32.xlu0 %v283_v37 }
  0x70   : > { %307 = vadd.xlane.f32.xlu1 %v286_v38 }
  0x71   : > { %305 = vadd.xlane.f32.xlu0 %v285_v39 }
  0x74   : > { %311 = vadd.xlane.f32.xlu1 %v288_v40 }
  0x75   : > { %309 = vadd.xlane.f32.xlu0 %v287_v41 }
  0x78   : > { %315 = vadd.xlane.f32.xlu1 %v290_v42 }
  0x79   : > { %313 = vadd.xlane.f32.xlu0 %v289_v43 }
  0x7c   : > { %319 = vadd.xlane.f32.xlu1 %v292_v44 }
  0x7d   : > { %317 = vadd.xlane.f32.xlu0 %v291_v45 }
  0x80   : > { %323 = vadd.xlane.f32.xlu1 %v294_v46 }
  0x81   : > { %321 = vadd.xlane.f32.xlu0 %v293_v47 }
  0x84   : > { %327 = vadd.xlane.f32.xlu1 %v296_v48 }
  0x85   : > { %325 = vadd.xlane.f32.xlu0 %v295_v49 }
  0x88   : > { %331 = vadd.xlane.f32.xlu1 %v907_v6 }
  0x89   : > { %329 = vadd.xlane.f32.xlu0 %v899_v2 }
  0x8c   : > { %335 = vadd.xlane.f32.xlu1 %v904_v5 }
  0x8d   : > { %333 = vadd.xlane.f32.xlu0 %v893_v0 }
  0x90   : > { %339 = vadd.xlane.f32.xlu1 %v912_v9 }
  0x91   : > { %337 = vadd.xlane.f32.xlu0 %v915_v10 }
  0x94   : > { %343 = vadd.xlane.f32.xlu1 %v920_v13 }
  0x95   : > { %341 = vadd.xlane.f32.xlu0 %v923_v14 }
  0x98   : > { %347 = vadd.xlane.f32.xlu1 %v928_v17 }
  0x99   : > { %345 = vadd.xlane.f32.xlu0 %v931_v18 }
  0x9c   : > { %351 = vadd.xlane.f32.xlu1 %v218_v21 }
  0x9d   : > { %349 = vadd.xlane.f32.xlu0 %v217_v22 }
  0xa0   : > { %355 = vadd.xlane.f32.xlu1 %v220_v25 }
  0xa1   : > { %353 = vadd.xlane.f32.xlu0 %v219_v26 }
  0xa4   : > { %359 = vadd.xlane.f32.xlu1 %v222_v29 }
  0xa5   : > { %357 = vadd.xlane.f32.xlu0 %v221_v30 }
  0xd5   : > { %v249_v50 = vpop.xlane.xlu1 %248 }
  0xd6   : > { %v245_v51 = vpop.xlane.xlu0 %244  ;;  %v379_v21 = vadd.f32 1.0, %v249_v50 }
  0xd7   : > { %v377_v14 = vadd.f32 1.0, %v245_v51 }
  0xd8   : > { %v397_v34 = vadd.f32 %v990_v16, %v379_v21 }
  0xd9   : > { %v251_v52 = vpop.xlane.xlu1 %250  ;;  %v395_v23 = vadd.f32 %v990_v16, %v377_v14 }
  0xda   : > { %v247_v53 = vpop.xlane.xlu0 %246  ;;  %v380_v22 = vadd.f32 1.0, %v251_v52  ;;  %v1019_v52 = vstv %s996_s24 }
  0xdb   : > { %v378_v15 = vadd.f32 1.0, %v247_v53 }
  0xdc   : > { %v398_v35 = vadd.f32 %v990_v16, %v380_v22 }
  0xdd   : > { %v255_v54 = vpop.xlane.xlu1 %254  ;;  %v396_v24 = vadd.f32 %v990_v16, %v378_v15 }
  0xde   : > { %v253_v55 = vpop.xlane.xlu0 %252  ;;  %v382_v25 = vadd.f32 1.0, %v255_v54 }
  0xdf   : > { %v381_v26 = vadd.f32 1.0, %v253_v55 }
  0xe0   : > { %v400_v40 = vadd.f32 %v990_v16, %v382_v25 }
  0xe1   : > { %v259_v56 = vpop.xlane.xlu1 %258  ;;  %v399_v41 = vadd.f32 %v990_v16, %v381_v26 }
  0xe2   : > { %v257_v57 = vpop.xlane.xlu0 %256  ;;  %v384_v36 = vadd.f32 1.0, %v259_v56 }
  0xe3   : > { %v383_v37 = vadd.f32 1.0, %v257_v57 }
  0xe4   : > { %v402_v50 = vadd.f32 %v990_v16, %v384_v36 }
  0xe5   : > { %v964_v58 = vpop.xlane.xlu1 %262  ;;  %v401_v51 = vadd.f32 %v990_v16, %v383_v37 }
  0xe6   : > { %v966_v59 = vpop.xlane.xlu0 %260 }
  0xe9   : > { %v968_v60 = vpop.xlane.xlu1 %266 }
  0xea   : > { %v970_v61 = vpop.xlane.xlu0 %264 }
  0xeb   : > { %v387_v21 = vadd.f32 1.0, %v970_v61 }
  0xed   : > { %v972_v62 = vpop.xlane.xlu1 %270 }
  0xee   : > { %v974_v63 = vpop.xlane.xlu0 %268 }
  0xf1   : > { %v976_v0 = vpop.xlane.xlu1 %274 }
  0xf2   : > { %v978_v1 = vpop.xlane.xlu0 %272 }
  0xf5   : > { %v300_v2 = vpop.xlane.xlu1 %299 }
  0xf6   : > { %v298_v3 = vpop.xlane.xlu0 %297  ;;  %v412_v19 = vadd.f32 1.0, %v300_v2 }
  0xf7   : > { %v411_v20 = vadd.f32 1.0, %v298_v3 }
  0xf8   : > { %v428_v31 = vmul.f32 %v412_v19, %v396_v24  ;;  %v385_v19 = vadd.f32 1.0, %v966_v59 }
  0xf9   : > { %v304_v4 = vpop.xlane.xlu1 %303  ;;  %v427_v32 = vmul.f32 %v411_v20, %v395_v23  ;;  %v388_v20 = vadd.f32 1.0, %v968_v60 }
  0xfa   : > { %v302_v5 = vpop.xlane.xlu0 %301  ;;  %v414_v27 = vadd.f32 1.0, %v304_v4  ;;  %v446_v47 = vadd.f32 %v1004_v33, %v428_v31  ;;  %v403_v36 = vadd.f32 %v990_v16, %v385_v19 }
  0xfb   : > { %v413_v28 = vadd.f32 1.0, %v302_v5  ;;  %v445_v48 = vadd.f32 %v1004_v33, %v427_v32  ;;  %v406_v37 = vadd.f32 %v990_v16, %v388_v20 }
  0xfc   : > { %v430_v42 = vmul.f32 %v414_v27, %v398_v35 }
  0xfd   : > { %v308_v6 = vpop.xlane.xlu1 %307  ;;  %v429_v43 = vmul.f32 %v413_v28, %v397_v34 }
  0xfe   : > { %v306_v7 = vpop.xlane.xlu0 %305  ;;  %v416_v38 = vadd.f32 1.0, %v308_v6  ;;  %v448_v3 = vadd.f32 %v1004_v33, %v430_v42 }
  0xff   : > { %v415_v39 = vadd.f32 1.0, %v306_v7  ;;  %v447_v5 = vadd.f32 %v1004_v33, %v429_v43 }
 0x100   : > { %v432_v53 = vmul.f32 %v416_v38, %v400_v40  ;;  %v405_v38 = vadd.f32 %v990_v16, %v387_v21 }
 0x101   : > { %v312_v8 = vpop.xlane.xlu1 %311  ;;  %v431_v54 = vmul.f32 %v415_v39, %v399_v41 }
 0x102   : > { %v310_v9 = vpop.xlane.xlu0 %309  ;;  %v418_v57 = vadd.f32 1.0, %v312_v8  ;;  %v450_v24 = vadd.f32 %v1004_v33, %v432_v53 }
 0x103   : > { %v417_v2 = vadd.f32 1.0, %v310_v9  ;;  %v386_v9 = vadd.f32 1.0, %v964_v58  ;;  %v449_v25 = vadd.f32 %v1004_v33, %v431_v54 }
 0x104   : > { %v434_v26 = vmul.f32 %v418_v57, %v402_v50  ;;  %v389_v50 = vadd.f32 1.0, %v974_v63 }
 0x105   : > { %v980_v10 = vpop.xlane.xlu1 %315  ;;  %v433_v27 = vmul.f32 %v417_v2, %v401_v51  ;;  %v404_v35 = vadd.f32 %v990_v16, %v386_v9 }
 0x106   : > { %v982_v11 = vpop.xlane.xlu0 %313  ;;  %v420_v58 = vadd.f32 1.0, %v980_v10  ;;  %v452_v43 = vadd.f32 %v1004_v33, %v434_v26 }
 0x107   : > { %v419_v59 = vadd.f32 1.0, %v982_v11 }
 0x108   : > { %v436_v41 = vmul.f32 %v420_v58, %v404_v35 }
 0x109   : > { %v984_v12 = vpop.xlane.xlu1 %319  ;;  %v435_v42 = vmul.f32 %v419_v59, %v403_v36 }
 0x10a   : > { %v986_v13 = vpop.xlane.xlu0 %317  ;;  %v422_v10 = vadd.f32 1.0, %v984_v12  ;;  %v454_v2 = vadd.f32 %v1004_v33, %v436_v41 }
 0x10b   : > { %v421_v11 = vadd.f32 1.0, %v986_v13 }
 0x10c   : > { %v438_v51 = vmul.f32 %v422_v10, %v406_v37 }
 0x10d   : > { %v992_v17 = vpop.xlane.xlu1 %323  ;;  %v437_v53 = vmul.f32 %v421_v11, %v405_v38 }
 0x10e   : > { %v994_v18 = vpop.xlane.xlu0 %321  ;;  %v456_v19 = vadd.f32 %v1004_v33, %v438_v51 }
 0x10f   : > { %v423_v57 = vadd.f32 1.0, %v994_v18  ;;  %v391_v18 = vadd.f32 1.0, %v978_v1  ;;  %v455_v20 = vadd.f32 %v1004_v33, %v437_v53 }
 0x111   : > { %v1000_v29 = vpop.xlane.xlu1 %327 }
 0x112   : > { %v1002_v30 = vpop.xlane.xlu0 %325 }
 0x115   : > { %v332_v44 = vpop.xlane.xlu1 %331 }
 0x116   : > { %v330_v45 = vpop.xlane.xlu0 %329  ;;  %v362_v46 = vmul.f32 7.8125e-05, %v332_v44 }
 0x117   : > { %v361_v49 = vmul.f32 7.8125e-05, %v330_v45  ;;  %v451_v45 = vadd.f32 %v1004_v33, %v433_v27 }
 0x118   : > { %v462_v55 = vmul.f32 %v446_v47, %v362_v46 }
 0x119   : > { %v461_v56 = vmul.f32 %v445_v48, %v361_v49  ;;  %v336_v4 = vpop.xlane.xlu1 %335  ;;  %v390_v49 = vadd.f32 1.0, %v972_v62  ;;  %v453_v62 = vadd.f32 %v1004_v33, %v435_v42 }
 0x11a   : > { %v334_v6 = vpop.xlane.xlu0 %333  ;;  %v480_v7 = vadd.f32 %v1019_v52, %v462_v55  ;;  %v364_v15 = vmul.f32 7.8125e-05, %v336_v4 }
 0x11b   : > { %v479_v14 = vadd.f32 %v1019_v52, %v461_v56  ;;  %v363_v8 = vmul.f32 7.8125e-05, %v334_v6  ;;  %v424_v56 = vadd.f32 1.0, %v992_v17  ;;  %v392_v17 = vadd.f32 1.0, %v976_v0 }
 0x11c   : > { %497 = vst.msk [vmem:[%s1024_s26 + $0x8] sm:$0xff] %vm495_vm0, %v480_v7  ;;  %v464_v22 = vmul.f32 %v448_v3, %v364_v15  ;;  %v407_v15 = vadd.f32 %v990_v16, %v389_v50  ;;  %v425_v0 = vadd.f32 1.0, %v1002_v30 }
 0x11d   : > { %496 = vst.msk [vmem:[%s1024_s26] sm:$0xff] %vm495_vm0, %v479_v14  ;;  %v463_v23 = vmul.f32 %v447_v5, %v363_v8  ;;  %v340_v60 = vpop.xlane.xlu1 %339  ;;  %v408_v14 = vadd.f32 %v990_v16, %v390_v49  ;;  %v410_v59 = vadd.f32 %v990_v16, %v392_v17 }
 0x11e   : > { %v338_v61 = vpop.xlane.xlu0 %337  ;;  %v482_v28 = vadd.f32 %v1019_v52, %v464_v22  ;;  %v366_v32 = vmul.f32 7.8125e-05, %v340_v60  ;;  %v439_v22 = vmul.f32 %v423_v57, %v407_v15  ;;  %v409_v60 = vadd.f32 %v990_v16, %v391_v18 }
 0x11f   : > { %v481_v31 = vadd.f32 %v1019_v52, %v463_v23  ;;  %v365_v34 = vmul.f32 7.8125e-05, %v338_v61  ;;  %v440_v21 = vmul.f32 %v424_v56, %v408_v14  ;;  %v426_v23 = vadd.f32 1.0, %v1000_v29 }
 0x120   : > { %499 = vst.msk [vmem:[%s1024_s26 + $0x18] sm:$0xff] %vm495_vm0, %v482_v28  ;;  %v466_v39 = vmul.f32 %v450_v24, %v366_v32  ;;  %v441_v28 = vmul.f32 %v425_v0, %v409_v60 }
 0x121   : > { %498 = vst.msk [vmem:[%s1024_s26 + $0x10] sm:$0xff] %vm495_vm0, %v481_v31  ;;  %v465_v40 = vmul.f32 %v449_v25, %v365_v34  ;;  %v344_v44 = vpop.xlane.xlu1 %343  ;;  %v442_v61 = vmul.f32 %v426_v23, %v410_v59  ;;  %v458_v31 = vadd.f32 %v1004_v33, %v440_v21  ;;  %v457_v34 = vadd.f32 %v1004_v33, %v439_v22 }
 0x122   : > { %v342_v46 = vpop.xlane.xlu0 %341  ;;  %v484_v12 = vadd.f32 %v1019_v52, %v466_v39  ;;  %v368_v47 = vmul.f32 7.8125e-05, %v344_v44  ;;  %v459_v41 = vadd.f32 %v1004_v33, %v441_v28 }
 0x123   : > { %v483_v13 = vadd.f32 %v1019_v52, %v465_v40  ;;  %v367_v48 = vmul.f32 7.8125e-05, %v342_v46  ;;  %v460_v39 = vadd.f32 %v1004_v33, %v442_v61 }
 0x124   : > { %501 = vst.msk [vmem:[%s1024_s26 + $0x28] sm:$0xff] %vm495_vm0, %v484_v12  ;;  %v468_v54 = vmul.f32 %v452_v43, %v368_v47 }
 0x125   : > { %500 = vst.msk [vmem:[%s1024_s26 + $0x20] sm:$0xff] %vm495_vm0, %v483_v13  ;;  %v467_v55 = vmul.f32 %v451_v45, %v367_v48  ;;  %v348_v3 = vpop.xlane.xlu1 %347 }
 0x126   : > { %v346_v63 = vpop.xlane.xlu0 %345  ;;  %v486_v4 = vadd.f32 %v1019_v52, %v468_v54  ;;  %v370_v6 = vmul.f32 7.8125e-05, %v348_v3 }
 0x127   : > { %v485_v5 = vadd.f32 %v1019_v52, %v467_v55  ;;  %v369_v7 = vmul.f32 7.8125e-05, %v346_v63 }
 0x128   : > { %503 = vst.msk [vmem:[%s1024_s26 + $0x38] sm:$0xff] %vm495_vm0, %v486_v4  ;;  %v470_v8 = vmul.f32 %v454_v2, %v370_v6 }
 0x129   : > { %502 = vst.msk [vmem:[%s1024_s26 + $0x30] sm:$0xff] %vm495_vm0, %v485_v5  ;;  %v469_v9 = vmul.f32 %v453_v62, %v369_v7  ;;  %v352_v24 = vpop.xlane.xlu1 %351 }
 0x12a   : > { %v350_v1 = vpop.xlane.xlu0 %349  ;;  %v488_v25 = vadd.f32 %v1019_v52, %v470_v8  ;;  %v372_v27 = vmul.f32 7.8125e-05, %v352_v24 }
 0x12b   : > { %v487_v26 = vadd.f32 %v1019_v52, %v469_v9  ;;  %v371_v58 = vmul.f32 7.8125e-05, %v350_v1 }
 0x12c   : > { %505 = vst.msk [vmem:[%s1024_s26 + $0x48] sm:$0xff] %vm495_vm0, %v488_v25  ;;  %v472_v29 = vmul.f32 %v456_v19, %v372_v27 }
 0x12d   : > { %504 = vst.msk [vmem:[%s1024_s26 + $0x40] sm:$0xff] %vm495_vm0, %v487_v26  ;;  %v471_v30 = vmul.f32 %v455_v20, %v371_v58  ;;  %v356_v32 = vpop.xlane.xlu1 %355 }
 0x12e   : > { %v354_v35 = vpop.xlane.xlu0 %353  ;;  %v490_v36 = vadd.f32 %v1019_v52, %v472_v29  ;;  %v374_v37 = vmul.f32 7.8125e-05, %v356_v32 }
 0x12f   : > { %v489_v16 = vadd.f32 %v1019_v52, %v471_v30  ;;  %v373_v38 = vmul.f32 7.8125e-05, %v354_v35 }
 0x130   : > { %507 = vst.msk [vmem:[%s1024_s26 + $0x58] sm:$0xff] %vm495_vm0, %v490_v36  ;;  %v474_v10 = vmul.f32 %v458_v31, %v374_v37 }
 0x131   : > { %506 = vst.msk [vmem:[%s1024_s26 + $0x50] sm:$0xff] %vm495_vm0, %v489_v16  ;;  %v473_v11 = vmul.f32 %v457_v34, %v373_v38  ;;  %v360_v40 = vpop.xlane.xlu1 %359 }
 0x132   : > { %v358_v42 = vpop.xlane.xlu0 %357  ;;  %v492_v43 = vadd.f32 %v1019_v52, %v474_v10  ;;  %v376_v45 = vmul.f32 7.8125e-05, %v360_v40 }
 0x133   : > { %v491_v44 = vadd.f32 %v1019_v52, %v473_v11  ;;  %v375_v46 = vmul.f32 7.8125e-05, %v358_v42 }
 0x134   : > { %509 = vst.msk [vmem:[%s1024_s26 + $0x68] sm:$0xff] %vm495_vm0, %v492_v43  ;;  %v476_v12 = vmul.f32 %v460_v39, %v376_v45 }
 0x135   : > { %508 = vst.msk [vmem:[%s1024_s26 + $0x60] sm:$0xff] %vm495_vm0, %v491_v44  ;;  %v475_v13 = vmul.f32 %v459_v41, %v375_v46 }
 0x136   : > { %v494_v47 = vadd.f32 %v1019_v52, %v476_v12 }
 0x137   : > { %v493_v48 = vadd.f32 %v1019_v52, %v475_v13 }
 0x138   : > { %511 = vst.msk [vmem:[%s1024_s26 + $0x78] sm:$0xff] %vm495_vm0, %v494_v47 }
 0x139   : > { %510 = vst.msk [vmem:[%s1024_s26 + $0x70] sm:$0xff] %vm495_vm0, %v493_v48 }
 0x13a PF: > { %p14_p13 = scmp.ge.s32.totalorder %s792_s17, 4   ;;  %s1138_s12 = smov %s738_s13 }
 0x13b   : > { %s1139_s13 = smov %s742_s14  ;;  %s1140_s14 = smov %s802_s20 }
 0x13c   : > { %s1141_s15 = smov %s792_s17  ;;  %16 = sbr.rel (!%p14_p13) target bundleno = 4 (0x4), region = 77 }
 0x143   :  { %534 = vsyncpa [#allocation3], 1 }
 0x144   :  { %536 = vsyncpa [#allocation3 + $0x1], 1 }
 0x145   :  { %537 = vsyncpa [#allocation4], 1 }
 0x146   :  { %539 = vsyncpa [#allocation4 + $0x1], 1 }

</bundles_post_ra>
